<compile_context>
chip_gen: v7x
topology: tpu7x:2x2x1
jax: 0.10.0
libtpu: 0.0.40
codegen_flags: <defaults>
</compile_context>

<pallas_src>
import functools

import jax
import jax.numpy as jnp
from jax.experimental import pallas as pl
from jax.experimental.pallas import tpu as pltpu


# ------------------------------- kernels ----------------------------------

def _se_fused_kernel(x_ref, w1t_ref, b1_ref, w2t_ref, b2_ref, o_ref, *, inv_hw):
    # x_ref block: (1, C, HW) -- one image, native dtype, spatial lane-dense.
    x = x_ref[...]
    # Squeeze: accumulate the spatial mean in f32 without materialising a
    # full-slab f32 copy of x.
    pooled = jnp.sum(x, axis=-1, dtype=jnp.float32) * inv_hw             # (1, C)
    # Excite: tiny row-vector matmuls (weights pre-transposed / f32).
    h = jnp.dot(pooled, w1t_ref[...], preferred_element_type=jnp.float32) + b1_ref[...]
    h = jnp.where(h > 0, h, 0.01 * h)                                    # LeakyReLU(0.01)
    g = jax.nn.sigmoid(
        jnp.dot(h, w2t_ref[...], preferred_element_type=jnp.float32) + b2_ref[...])
    # Scale: cast only the tiny gate; x stays in its native dtype.
    o_ref[...] = x * g.astype(o_ref.dtype)[:, :, None]


def _se_pool_gate_kernel(x_ref, w1t_ref, b1_ref, w2t_ref, b2_ref, g_ref,
                         acc_ref, *, inv_hw):
    # Fallback phase 1: grid = (N, S_tiles); streaming f32 sum, gate at the end.
    s = pl.program_id(1)

    @pl.when(s == 0)
    def _init():
        acc_ref[...] = jnp.zeros_like(acc_ref)

    acc_ref[...] += jnp.sum(x_ref[...], axis=-1, dtype=jnp.float32)      # (1, C)

    @pl.when(s == pl.num_programs(1) - 1)
    def _finish():
        pooled = acc_ref[...] * inv_hw                                    # (1, C)
        h = jnp.dot(pooled, w1t_ref[...], preferred_element_type=jnp.float32) + b1_ref[...]
        h = jnp.where(h > 0, h, 0.01 * h)
        g = jax.nn.sigmoid(
            jnp.dot(h, w2t_ref[...], preferred_element_type=jnp.float32) + b2_ref[...])
        g_ref[...] = g[:, :, None]                                        # (1, C, 1)


def _se_scale_kernel(x_ref, g_ref, o_ref):
    # Fallback phase 2: pure channel rescale, fully parallel grid.
    o_ref[...] = x_ref[...] * g_ref[...].astype(o_ref.dtype)


# ------------------------------- wrapper ----------------------------------

def _pick_spatial_tile(hw, c, itemsize, tile_budget_bytes):
    """Largest spatial tile that divides HW, is lane-aligned (multiple of 128
    or the full extent) and fits the per-block byte budget."""
    best = hw
    for k in range(1, hw + 1):
        if hw % k:
            continue
        thw = hw // k
        if thw != hw and thw % 128 != 0:
            if thw < 128:
                break
            continue
        best = thw
        if c * thw * itemsize <= tile_budget_bytes:
            return thw
    return best


def se_block(x, w1, b1, w2, b2, *, fused_slab_limit_bytes=12 * 1024 * 1024):
    """SEBlock forward.

    x : (N, C, H, W)      input feature map (NCHW, as in PyTorch)
    w1: (R, C), b1: (R,)  1x1 conv  in_planes -> reduced_dim
    w2: (C, R), b2: (C,)  1x1 conv  reduced_dim -> in_planes

    fused_slab_limit_bytes: per-image C*H*W slab size above which the fused
    single-pass kernel is replaced by the two-phase (pool+gate, scale) path.
    12 MiB keeps 2 double-buffered input + 2 output slabs under ~48 MiB (safe
    for v7x's 64 MiB physical VMEM); on v5e/v6e it could be raised to ~28 MiB.
    """
    N, C, H, W = x.shape
    R = w1.shape[0]
    HW = H * W
    itemsize = jnp.dtype(x.dtype).itemsize
    slab_bytes = C * HW * itemsize
    inv_hw = 1.0 / float(HW)

    # Metadata-only reshape (array stays contiguous): no extra HBM copy.
    x3 = x.reshape(N, C, HW)

    # Weights: f32, transposed to row-matmul form, whole-array resident in VMEM.
    w1t = jnp.asarray(w1, jnp.float32).T              # (C, R)
    b1r = jnp.asarray(b1, jnp.float32).reshape(1, R)
    w2t = jnp.asarray(w2, jnp.float32).T              # (R, C)
    b2r = jnp.asarray(b2, jnp.float32).reshape(1, C)
    w_bytes = 4 * (w1t.size + b1r.size + w2t.size + b2r.size)
    weight_specs = [pl.BlockSpec(memory_space=pltpu.MemorySpace.VMEM)] * 4

    # TODO(synk): if C < 8 and N is large, pack several images per block
    # (reshape x to (N//Nb, Nb*C, HW)) to fill all 8 sublanes; modest win.
    # TODO(synk): for N == 1 on v7x the fused grid has a single step and one
    # TensorCore idles; a channel-group split of the scale phase would fix it.

    if slab_bytes <= fused_slab_limit_bytes:
        # ---------------- fused single-pass path ----------------
        vmem_limit = int(min(128 << 20,
                             max(32 << 20, 4 * slab_bytes + w_bytes + (2 << 20))))
        out3 = pl.pallas_call(
            functools.partial(_se_fused_kernel, inv_hw=inv_hw),
            out_shape=jax.ShapeDtypeStruct((N, C, HW), x.dtype),
            grid_spec=pltpu.PrefetchScalarGridSpec(
                num_scalar_prefetch=0,
                grid=(N,),
                in_specs=[pl.BlockSpec((1, C, HW), lambda n: (n, 0, 0))] + weight_specs,
                out_specs=pl.BlockSpec((1, C, HW), lambda n: (n, 0, 0)),
            ),
            compiler_params=pltpu.CompilerParams(
                dimension_semantics=("parallel",),
                vmem_limit_bytes=vmem_limit,
            ),
            cost_estimate=pl.CostEstimate(
                flops=int(2 * N * C * HW + 4 * N * C * R),
                transcendentals=int(N * C),
                bytes_accessed=int(2 * N * slab_bytes + w_bytes),
            ),
        )(x3, w1t, b1r, w2t, b2r)
        return out3.reshape(N, C, H, W)

    # ---------------- two-phase fallback (large slabs) ----------------
    tile_budget = max(min(fused_slab_limit_bytes, 8 << 20), 1)
    thw = _pick_spatial_tile(HW, C, itemsize, tile_budget)
    s_tiles = HW // thw
    tile_bytes = C * thw * itemsize
    vmem_limit = int(min(128 << 20,
                         max(32 << 20, 4 * tile_bytes + w_bytes + (2 << 20))))

    # Phase 1: streaming pool + gate.  x read once; tiny gate (N, C, 1) written.
    gate = pl.pallas_call(
        functools.partial(_se_pool_gate_kernel, inv_hw=inv_hw),
        out_shape=jax.ShapeDtypeStruct((N, C, 1), jnp.float32),
        grid_spec=pltpu.PrefetchScalarGridSpec(
            num_scalar_prefetch=0,
            grid=(N, s_tiles),
            in_specs=[pl.BlockSpec((1, C, thw), lambda n, s: (n, 0, s))] + weight_specs,
            out_specs=pl.BlockSpec((1, C, 1), lambda n, s: (n, 0, 0)),
            scratch_shapes=[pltpu.VMEM((1, C), jnp.float32)],
        ),
        compiler_params=pltpu.CompilerParams(
            dimension_semantics=("parallel", "arbitrary"),
            vmem_limit_bytes=vmem_limit,
        ),
        cost_estimate=pl.CostEstimate(
            flops=int(N * C * HW + 4 * N * C * R),
            transcendentals=int(N * C),
            bytes_accessed=int(N * slab_bytes + 4 * N * C + w_bytes),
        ),
    )(x3, w1t, b1r, w2t, b2r)

    # Phase 2: fully parallel channel rescale.  x read once, out written once.
    out3 = pl.pallas_call(
        _se_scale_kernel,
        out_shape=jax.ShapeDtypeStruct((N, C, HW), x.dtype),
        grid_spec=pltpu.PrefetchScalarGridSpec(
            num_scalar_prefetch=0,
            grid=(N, s_tiles),
            in_specs=[
                pl.BlockSpec((1, C, thw), lambda n, s: (n, 0, s)),
                pl.BlockSpec((1, C, 1), lambda n, s: (n, 0, 0)),
            ],
            out_specs=pl.BlockSpec((1, C, thw), lambda n, s: (n, 0, s)),
        ),
        compiler_params=pltpu.CompilerParams(
            dimension_semantics=("parallel", "parallel"),
            vmem_limit_bytes=vmem_limit,
        ),
        cost_estimate=pl.CostEstimate(
            flops=int(N * C * HW),
            transcendentals=0,
            bytes_accessed=int(2 * N * slab_bytes + 4 * N * C),
        ),
    )(x3, gate)
    return out3.reshape(N, C, H, W)


if __name__ == "__main__":
    key = jax.random.PRNGKey(0)
    k_x, k_w1, k_b1, k_w2, k_b2 = jax.random.split(key, 5)

    # Small deterministic shapes consistent with the module: NCHW input,
    # in_planes=4, reduced_dim=2.
    N, C, H, W = 2, 4, 16, 16
    R = 2

    x = jax.random.normal(k_x, (N, C, H, W), dtype=jnp.float32)
    # Conv2d(kernel_size=1) weights squeezed to 2-D matrices.
    w1 = jax.random.normal(k_w1, (R, C), dtype=jnp.float32) * 0.5
    b1 = jax.random.normal(k_b1, (R,), dtype=jnp.float32) * 0.1
    w2 = jax.random.normal(k_w2, (C, R), dtype=jnp.float32) * 0.5
    b2 = jax.random.normal(k_b2, (C,), dtype=jnp.float32) * 0.1

    # Fused single-pass path (default) and the large-slab two-phase fallback
    # (forced via a zero threshold) -- both must match the reference.
    y_fused = se_block(x, w1, b1, w2, b2)
    y_tiled = se_block(x, w1, b1, w2, b2, fused_slab_limit_bytes=0)
    jax.block_until_ready((y_fused, y_tiled))

    # Pure-JAX reference matching the PyTorch forward exactly.
    pooled = jnp.mean(x, axis=(2, 3))                         # (N, C)
    h_ref = pooled @ w1.T + b1[None, :]                       # (N, R)
    h_ref = jnp.where(h_ref > 0, h_ref, 0.01 * h_ref)         # LeakyReLU(0.01)
    g_ref = jax.nn.sigmoid(h_ref @ w2.T + b2[None, :])        # (N, C)
    y_ref = x * g_ref[:, :, None, None]

    assert y_fused.shape == x.shape and y_fused.dtype == x.dtype
    assert y_tiled.shape == x.shape and y_tiled.dtype == x.dtype
    err_fused = float(jnp.max(jnp.abs(y_fused - y_ref)))
    err_tiled = float(jnp.max(jnp.abs(y_tiled - y_ref)))
    assert err_fused < 1e-5, f"fused path max abs err {err_fused}"
    assert err_tiled < 1e-5, f"tiled path max abs err {err_tiled}"

    print("KERNEL_OK")
</pallas_src>

<mosaic_0001>
module attributes {stable_mosaic.version = 11 : i64} {
  func.func @_se_fused_kernel(%arg0: i32, %arg1: memref<1x4x256xf32, #tpu.memory_space<vmem>>, %arg2: memref<4x2xf32, #tpu.memory_space<vmem>>, %arg3: memref<1x2xf32, #tpu.memory_space<vmem>>, %arg4: memref<2x4xf32, #tpu.memory_space<vmem>>, %arg5: memref<1x4xf32, #tpu.memory_space<vmem>>, %arg6: memref<1x4x256xf32, #tpu.memory_space<vmem>>) attributes {dimension_semantics = [#tpu.dimension_semantics<parallel>], iteration_bounds = array<i64: 2>, scalar_prefetch = 0 : i64, scratch_operands = 0 : i64, tpu.core_type = #tpu.core_type<tc>, window_params = [{transform_indices = @transform_0, window_bounds = array<i64: 1, 4, 256>}, {pipeline_mode = #tpu.pipeline_mode<synchronous>, transform_indices = @transform_1, window_bounds = array<i64: 4, 2>}, {pipeline_mode = #tpu.pipeline_mode<synchronous>, transform_indices = @transform_2, window_bounds = array<i64: 1, 2>}, {pipeline_mode = #tpu.pipeline_mode<synchronous>, transform_indices = @transform_3, window_bounds = array<i64: 2, 4>}, {pipeline_mode = #tpu.pipeline_mode<synchronous>, transform_indices = @transform_4, window_bounds = array<i64: 1, 4>}, {transform_indices = @transform_5, window_bounds = array<i64: 1, 4, 256>}]} {
    %c0 = arith.constant 0 : index
    %c0_0 = arith.constant 0 : index
    %c0_1 = arith.constant 0 : index
    %0 = vector.load %arg1[%c0, %c0_0, %c0_1] : memref<1x4x256xf32, #tpu.memory_space<vmem>>, vector<1x4x256xf32>
    %cst = arith.constant dense<0.000000e+00> : vector<1x4xf32>
    %1 = vector.multi_reduction <add>, %0, %cst [2] : vector<1x4x256xf32> to vector<1x4xf32>
    %cst_2 = arith.constant 3.906250e-03 : f32
    %2 = vector.broadcast %cst_2 : f32 to vector<1x4xf32>
    %3 = arith.mulf %1, %2 : vector<1x4xf32>
    %c0_3 = arith.constant 0 : index
    %c0_4 = arith.constant 0 : index
    %4 = vector.load %arg2[%c0_3, %c0_4] : memref<4x2xf32, #tpu.memory_space<vmem>>, vector<4x2xf32>
    %cst_5 = arith.constant dense<0.000000e+00> : vector<1x2xf32>
    %5 = tpu.matmul %3, %4, %cst_5 {dimension_numbers = #tpu.dot_dimension_numbers<[1], [0], [0], [1], [0, 0, 1, 1], [], []>} : vector<1x4xf32>, vector<4x2xf32>, vector<1x2xf32> -> vector<1x2xf32>
    %c0_6 = arith.constant 0 : index
    %c0_7 = arith.constant 0 : index
    %6 = vector.load %arg3[%c0_6, %c0_7] : memref<1x2xf32, #tpu.memory_space<vmem>>, vector<1x2xf32>
    %7 = arith.addf %5, %6 : vector<1x2xf32>
    %cst_8 = arith.constant 0.000000e+00 : f32
    %8 = vector.broadcast %cst_8 : f32 to vector<1x2xf32>
    %9 = arith.cmpf ogt, %7, %8 : vector<1x2xf32>
    %cst_9 = arith.constant 0.00999999977 : f32
    %10 = vector.broadcast %cst_9 : f32 to vector<1x2xf32>
    %11 = arith.mulf %10, %7 : vector<1x2xf32>
    %12 = arith.select %9, %7, %11 : vector<1x2xi1>, vector<1x2xf32>
    %c0_10 = arith.constant 0 : index
    %c0_11 = arith.constant 0 : index
    %13 = vector.load %arg4[%c0_10, %c0_11] : memref<2x4xf32, #tpu.memory_space<vmem>>, vector<2x4xf32>
    %cst_12 = arith.constant dense<0.000000e+00> : vector<1x4xf32>
    %14 = tpu.matmul %12, %13, %cst_12 {dimension_numbers = #tpu.dot_dimension_numbers<[1], [0], [0], [1], [0, 0, 1, 1], [], []>} : vector<1x2xf32>, vector<2x4xf32>, vector<1x4xf32> -> vector<1x4xf32>
    %c0_13 = arith.constant 0 : index
    %c0_14 = arith.constant 0 : index
    %15 = vector.load %arg5[%c0_13, %c0_14] : memref<1x4xf32, #tpu.memory_space<vmem>>, vector<1x4xf32>
    %16 = arith.addf %14, %15 : vector<1x4xf32>
    %17 = arith.negf %16 : vector<1x4xf32>
    %18 = math.exp %17 : vector<1x4xf32>
    %cst_15 = arith.constant 1.000000e+00 : f32
    %19 = vector.broadcast %cst_15 : f32 to vector<1x4xf32>
    %20 = arith.addf %19, %18 : vector<1x4xf32>
    %21 = arith.divf %19, %20 : vector<1x4xf32>
    %22 = vector.shape_cast %21 : vector<1x4xf32> to vector<1x4x1xf32>
    %23 = vector.broadcast %22 : vector<1x4x1xf32> to vector<1x4x256xf32>
    %24 = arith.mulf %0, %23 : vector<1x4x256xf32>
    %c0_16 = arith.constant 0 : index
    %c0_17 = arith.constant 0 : index
    %c0_18 = arith.constant 0 : index
    %25 = vector.load %arg6[%c0_16, %c0_17, %c0_18] : memref<1x4x256xf32, #tpu.memory_space<vmem>>, vector<1x4x256xf32>
    tpu.vector_store %arg6[%c0_16, %c0_17, %c0_18], %24 {strides = array<i32>} : memref<1x4x256xf32, #tpu.memory_space<vmem>>, vector<1x4x256xf32>,
    return
  }
  func.func @transform_0(%arg0: i32) -> (i32, i32, i32) {
    %c0_i32 = arith.constant 0 : i32
    %c0_i32_0 = arith.constant 0 : i32
    %c0_i32_1 = arith.constant 0 : i32
    return %arg0, %c0_i32, %c0_i32_0 : i32, i32, i32
  }
  func.func @transform_1(%arg0: i32) -> (i32, i32) {
    %c0_i32 = arith.constant 0 : i32
    %c0_i32_0 = arith.constant 0 : i32
    %c0_i32_1 = arith.constant 0 : i32
    return %c0_i32, %c0_i32_0 : i32, i32
  }
  func.func @transform_2(%arg0: i32) -> (i32, i32) {
    %c0_i32 = arith.constant 0 : i32
    %c0_i32_0 = arith.constant 0 : i32
    %c0_i32_1 = arith.constant 0 : i32
    return %c0_i32, %c0_i32_0 : i32, i32
  }
  func.func @transform_3(%arg0: i32) -> (i32, i32) {
    %c0_i32 = arith.constant 0 : i32
    %c0_i32_0 = arith.constant 0 : i32
    %c0_i32_1 = arith.constant 0 : i32
    return %c0_i32, %c0_i32_0 : i32, i32
  }
  func.func @transform_4(%arg0: i32) -> (i32, i32) {
    %c0_i32 = arith.constant 0 : i32
    %c0_i32_0 = arith.constant 0 : i32
    %c0_i32_1 = arith.constant 0 : i32
    return %c0_i32, %c0_i32_0 : i32, i32
  }
  func.func @transform_5(%arg0: i32) -> (i32, i32, i32) {
    %c0_i32 = arith.constant 0 : i32
    %c0_i32_0 = arith.constant 0 : i32
    %c0_i32_1 = arith.constant 0 : i32
    return %arg0, %c0_i32, %c0_i32_0 : i32, i32, i32
  }
}

</mosaic_0001>

<bundles_post_ra>
// kernel: tpu_custom_call.1
= control target key start
LH: loop header
LB: loop body
LE: loop exit
PB: predicated region body
PF: predicated region fallthrough
CT: control target
= control target key end

     0   :  { %10 = vsyncpa [#allocation3], 0  ;;  %s928_s0 = inlined_call_operand.hbm [shape: f32[2,4,256], index: 0, kind: input, shape index: {}]   ;;  %s929_s1 = inlined_call_operand.vmem [shape: f32[4,2], index: 1, kind: input, shape index: {}]   ;;  %s930_s2 = inlined_call_operand.vmem [shape: f32[1,2], index: 2, kind: input, shape index: {}]   ;;  %s931_s3 = inlined_call_operand.vmem [shape: f32[2,4], index: 3, kind: input, shape index: {}]   ;;  %s932_s4 = inlined_call_operand.vmem [shape: f32[1,4], index: 4, kind: input, shape index: {}]   ;;  %s933_s5 = inlined_call_operand.hbm [shape: f32[2,4,256], index: 5, kind: output, shape index: {}]  }
   0x1   :  { %12 = vsyncpa [#allocation3 + $0x1], 0 }
   0x2   :  { %13 = vsyncpa [#allocation4], 0 }
   0x3   :  { %15 = vsyncpa [#allocation4 + $0x1], 0  ;;  %s751_s18 = smov 0   ;;  %s753_s19 = smov 0  }
   0x4   :  { %s755_s20 = smov 0   ;;  %s757_s21 = smov 0  }
   0x5 LB: > { %s772_s22 = sadd.s32 4294967295, %s714_s21   ;;  %s529_s23 = sadd.s32 4294967294, %s714_s21   ;;  %s714_s21 = sphi %s757_s21, %s948_s21   ;;  %s710_s20 = sphi %s755_s20, %s947_s20   ;;  %s706_s19 = sphi %s753_s19, %s946_s19   ;;  %s702_s18 = sphi %s751_s18, %s945_s18  }
   0x6   : > { %s776_s24 = sadd.s32 1, %s714_s21   ;;  %s28_s25 = sadd.s32 1, %s710_s20 }
   0x7   : > { %s25_s26 = ssub.s32 %s714_s21, %s776_s24  ;;  %p35_p0 = scmp.ne.s32.totalorder %s710_s20, %s706_s19 }
   0x8   : > { %p26_p1 = scmp.eq.s32.totalorder %s25_s26, 0  ;;  %p36_p2 = scmp.eq.s32.totalorder %s714_s21, 0 }
   0x9   : > { %p41_p3 = scmp.ne.s32.totalorder %s706_s19, %s702_s18  ;;  %p42_p4 = scmp.eq.s32.totalorder %s772_s22, 0 }
   0xa   : > { %s788_s27 = scalar_select %p26_p1, %s710_s20, %s28_s25  }
   0xb   : > { %p790_p5 = por %p36_p2, %p35_p0  ;;  %p794_p6 = por %p42_p4, %p41_p3 }
   0xc   : > { %p149_p7 = scmp.eq.s32.totalorder %s772_s22, 1  ;;  %p155_p8 = scmp.eq.s32.totalorder %s529_s23, 1 }
   0xd   : > { %p576_p10 = scmp.lt.s32.totalorder %s714_s21, 2  ;;  %s187_s7 = sand.u32 1, %s710_s20  }
   0xe   : > { %p801_p11 = por %p149_p7, %p35_p0  ;;  %p805_p12 = por %p155_p8, %p41_p3 }
   0xf   : > { %s548_s8 = sshll.u32 %s714_s21, 7  ;;  %s532_s9 = sshll.u32 %s187_s7, 3 }
  0x10   : > { %s937_s30 = scalar_select %p801_p11, 1, 0 }
  0x11   : > { %s938_s6 = scalar_select %p805_p12, 1, 0 }
  0x12   : > { %s814_s12 = scalar_lea.hbm %s928_s0, %s548_s8  ;;  %s191_s13 = scalar_lea.vmem [#allocation2], %s532_s9 }
  0x13   : > { %s199_s14 = sshll.u32 %s191_s13, 4  ;;  %p818_p13 = pnand %p576_p10, %p790_p5  ;;  %s822_s14 = int_to_ptr.vmem [resolvable:$true] %s199_s14 }
  0x14   : > { %s188_s16 = scalar_lea.sflag [#allocation3], %s187_s7  ;;  %s618_s17 = scalar_lea.hbm %s814_s12, 128 }
  0x15   : > { %p619_p2 = scmp.ne.s32.totalorder %s814_s12, %s618_s17  ;;  %p620_p3 = pneg %p818_p13 }
  0x16   : > { %s623_s26 = scalar_lea.hbm %s928_s0, 256  ;;  %p624_p5 = scmp.lt.u32.totalorder %s814_s12, %s928_s0 }
  0x17   : > { %p621_p4 = pnand %p620_p3, %p619_p2  ;;  %p625_p8 = scmp.lt.u32.totalorder %s623_s26, %s618_s17 }
  0x18   : > { %p627_p9 = scmp.lt.u32.totalorder %s618_s17, %s814_s12 }
  0x19   : > { %p622_p7 = pneg %p621_p4  ;;  %p626_p10 = por %p625_p8, %p624_p5 }
  0x1b   : > { %p628_p0 = por %p627_p9, %p626_p10 }
  0x1d   : > { %p629_p1 = pnand %p628_p0, %p622_p7 }
  0x1f   : > { %632 = shalt.err (!%p629_p1)
}
  0x20   : > { %s633_s7 = scalar_lea.vmem %s822_s14, 128  ;;  %s716_s9 = smov [#allocation2]  }
  0x21   : > { %p634_p2 = scmp.ne.s32.totalorder %s822_s14, %s633_s7  ;;  %s638_s10 = sshll.u32 %s716_s9, 4  ;;  %s639_s10 = int_to_ptr.vmem [resolvable:$false] %s638_s10 }
  0x22   : > { %s640_s11 = scalar_lea.vmem %s639_s10, 256  ;;  %p641_p11 = scmp.lt.s32.totalorder %s822_s14, %s639_s10 }
  0x23   : > { %p636_p4 = pnand %p634_p2, %p620_p3  ;;  %p642_p5 = scmp.lt.s32.totalorder %s640_s11, %s633_s7 }
  0x25   : > { %p637_p12 = pneg %p636_p4  ;;  %p643_p8 = por %p642_p5, %p641_p11 }
  0x27   : > { %p644_p9 = pnand %p643_p8, %p637_p12 }
  0x29   : > { %647 = shalt.err (!%p644_p9)
}
  0x2a   : > { %571 = dma.hbm_to_vmem [thread:$0]  (!%p818_p13), %s814_s12, 128, %s822_s14, %s188_s16  }
  0x2b   : > { %p940_p0 = scmp.lt.s32.totalorder %s714_s21, 3  ;;  %p941_p1 = scmp.ge.s32.totalorder %s714_s21, 1 }
  0x2d   : > { %p205_p3 = pnand %p941_p1, %p940_p0 }
  0x2e   : > { %s856_s13 = sand.u32 (!%p205_p3), 1, %s706_s19  }
  0x2f   : > { %208 = sbr.rel (%p205_p3) target bundleno = 799 (0x31f), region = 40  ;;  %s536_s17 = sshll.u32 (!%p205_p3), %s856_s13, 3 }
  0x30   : > { %s211_s23 = scalar_lea.sflag (!%p205_p3), [#allocation3], %s856_s13  ;;  %s214_s15 = scalar_lea.vmem (!%p205_p3), [#allocation2], %s536_s17 }
  0x36   : > { %693 = dma.done.wait (%p794_p6), %s211_s23, 128  }
  0x37   : > { %695 = vsyncadd (%p794_p6), %s211_s23, 4294967168  ;;  %vm245_vm0 = vcmask 1043456   ;;  %v241_v0 = vld [vmem:[%s214_s15] sm:$0xff]  ;;  %v717_v5 = vmov 0.0   ;;  %vm718_vm1 = vmmov 0   ;;  %v255_v7 = vlaneseq  ;;  %s549_s7 = sshll.u32 %s772_s22, 7 }
  0x38   : > { %v243_v1 = vcombine.high %v241_v0, %v241_v0  ;;  %v246_v2 = vsel %vm245_vm0, %v241_v0, 0.0  ;;  %554 = vmatprep.subr.mxu0 %v717_v5  ;;  %v252_v6 = vld [vmem:[%s929_s1] sm:$0xf]  ;;  %559 = vmatprep.subr.mxu1 %v717_v5  ;;  %vm261_vm2 = vcmask 31744   ;;  %vm346_vm3 = vcmask 1041408   ;;  %s240_s9 = scalar_lea.vmem [#allocation5], %s536_s17  ;;  %s884_s15 = scalar_lea.hbm %s933_s5, %s549_s7 }
  0x39   : > { %555 = vmatpush3.msk.msra.mxu0 %vm245_vm0, %v252_v6  ;;  %556 = vmatprep.mubr.msk.f32.mxu0 %vm718_vm1, %v717_v5  ;;  %v256_v8 = vand.u32 127, %v255_v7  ;;  %v258_v9 = vshrl.u32 %v255_v7, 7  ;;  %v340_v14 = vld [vmem:[%s931_s3] sm:$0x3]  ;;  %vm342_vm5 = vcmask 15360   ;;  %s459_s10 = sshll.u32 %s240_s9, 4  ;;  %s886_s10 = int_to_ptr.vmem [resolvable:$true] %s459_s10 }
  0x3a   : > { %v247_v3 = vsel %vm245_vm0, %v243_v1, 0.0  ;;  %561 = vmatprep.mubr.msk.f32.mxu1 %vm718_vm1, %v717_v5  ;;  %560 = vmatpush3.msk.msra.mxu1 %vm346_vm3, %v340_v14  ;;  %v253_v15 = vld [vmem:[%s930_s2] sm:$0x1]  ;;  %v719_v31 = vmov 839922192   ;;  %s445_s12 = scalar_lea.sflag [#allocation4], %s856_s13 }
  0x3b   : > { %v248_v4 = vadd.f32 %v247_v3, %v246_v2  ;;  %v259_v10 = vsub.s32 %v256_v8, %v258_v9  ;;  %v341_v21 = vld [vmem:[%s932_s4] sm:$0x1]  ;;  %v428_v28 = vsub.s32 0, %v258_v9  ;;  %v435_v32 = vunpack.c.l.s4 %v719_v31  ;;  %s648_s14 = scalar_lea.vmem %s886_s10, 128  ;;  %p942_p11 = scmp.ne.s32.totalorder %s937_s30, 0 }
  0x3c   : > { %p649_p6 = scmp.ne.s32.totalorder %s886_s10, %s648_s14  ;;  %s720_s22 = smov [#allocation5]  }
  0x3d   : > { %249 = vadd.xlane.f32.xlu0 %v248_v4  ;;  %v436_v33 = vunpack.c.0.s8 %v435_v32  ;;  %s652_s17 = sshll.u32 %s720_s22, 4  ;;  %s653_s17 = int_to_ptr.vmem [resolvable:$false] %s652_s17 }
  0x3e   : > { %p650_p12 = pnand %p649_p6, %p942_p11  ;;  %s654_s29 = scalar_lea.vmem %s653_s17, 256 }
  0x3f   : > { %v439_v34 = vsub.s32 %v436_v33, %v258_v9  ;;  %p655_p7 = scmp.lt.s32.totalorder %s886_s10, %s653_s17  ;;  %p656_p10 = scmp.lt.s32.totalorder %s654_s29, %s648_s14 }
  0x40   : > { %p651_p13 = pneg %p650_p12 }
  0x41   : > { %p657_p2 = por %p656_p10, %p655_p7 }
  0x43   : > { %p658_p4 = pnand %p657_p2, %p651_p13 }
  0xca   : > { %v250_v11 = vpop.xlane.xlu0 %249 }
  0xcb   : > { %v251_v12 = vmul.f32 0.00390625, %v250_v11 }
  0xcd   : > { %v260_v13 = vrot.slane %v251_v12, %v259_v10 }
  0xcf   : > { %557 = vmatmul.mubr.msk.f32.vlgmr.msra.gmra.mrb[0].mxu0 %vm261_vm2, %v260_v13 }
 0x1a2   : > { %v333_v16 = vpop.f32.mrb[0].mxu0 }
 0x1a3   : > { %v334_v17 = vadd.f32 %v333_v16, %v253_v15  ;;  %v558_v18 = vpop.f32.mrb[1].mxu0 }
 0x1a5   : > { %vm337_vm4 = vcmp.gt.f32.partialorder %v334_v17, 0.0  ;;  %v338_v19 = vmul.f32 0.01, %v334_v17 }
 0x1a7   : > { %v339_v20 = vsel %vm337_vm4, %v334_v17, %v338_v19 }
 0x1a8   : > { %562 = vmatmul.mubr.msk.f32.vlgmr.msra.gmra.mrb[0].mxu1 %vm342_vm5, %v339_v20 }
 0x27b   : > { %v416_v22 = vpop.f32.mrb[0].mxu1 }
 0x27c   : > { %v417_v23 = vadd.f32 %v416_v22, %v341_v21  ;;  %v563_v24 = vpop.f32.mrb[1].mxu1 }
 0x27e   : > { %v542_v25 = vmul.f32 -1.442695, %v417_v23 }
 0x280   : > { %614 = vpow2.f32 %v542_v25 }
 0x28a   : > { %v615_v26 = vpop.eup %614 }
 0x28b   : > { %v423_v27 = vadd.f32 1.0, %v615_v26 }
 0x28d   : > { %616 = vrcp.f32 %v423_v27 }
 0x297   : > { %v617_v29 = vpop.eup %616 }
 0x298   : > { %v429_v30 = vrot.slane %v617_v29, %v428_v28 }
 0x29a   : > { %431 = vbcast.lane.b32.xlu0 %v429_v30, 256 }
 0x30c   : > { %v432_v35 = vpop.permute.xlu0 %431 }
 0x30d   : > { %v440_v36 = vrot.slane %v432_v35, %v439_v34 }
 0x30f   : > { %v442_v37 = vmul.f32 %v440_v36, %v241_v0 }
 0x311   : > { %443 = vst [vmem:[%s240_s9] sm:$0xff] %v442_v37 }
 0x312   : > { %661 = shalt.err (!%p658_p4)
}
 0x313   : > { %s662_s13 = scalar_lea.hbm %s884_s15, 128  ;;  %s666_s26 = scalar_lea.hbm %s933_s5, 256 }
 0x314   : > { %p663_p5 = scmp.ne.s32.totalorder %s884_s15, %s662_s13  ;;  %p667_p0 = scmp.lt.u32.totalorder %s884_s15, %s933_s5 }
 0x315   : > { %p668_p1 = scmp.lt.u32.totalorder %s666_s26, %s662_s13  ;;  %p670_p6 = scmp.lt.u32.totalorder %s662_s13, %s884_s15 }
 0x316   : > { %p664_p8 = pnand %p663_p5, %p942_p11 }
 0x317   : > { %p669_p3 = por %p668_p1, %p667_p0 }
 0x318   : > { %p665_p9 = pneg %p664_p8 }
 0x319   : > { %p671_p12 = por %p670_p6, %p669_p3 }
 0x31b   : > { %p672_p13 = pnand %p671_p12, %p665_p9 }
 0x31d   : > { %675 = shalt.err (!%p672_p13)
}
 0x31e   : > { %566 = dma.vmem_to_hbm [thread:$0]  (%p942_p11), %s886_s10, 128, %s884_s15, %s445_s12  }
 0x31f PF: > { %s471_s7 = sand.u32 1, %s702_s18   ;;  %p943_p7 = scmp.ne.s32.totalorder %s938_s6, 0 }
 0x320   : > { %p944_p10 = scmp.ge.s32.totalorder %s714_s21, 2  ;;  %s472_s9 = scalar_lea.sflag [#allocation4], %s471_s7 }
 0x322   : > { %p573_p2 = pnand %p944_p10, %p943_p7 }
 0x324   : > { %697 = dma.done.wait (!%p573_p2), %s472_s9, 128  }
 0x325   : > { %699 = vsyncadd (!%p573_p2), %s472_s9, 4294967168  ;;  %p18_p4 = scmp.ge.s32.totalorder %s776_s24, 4   ;;  %s945_s18 = smov %s706_s19 }
 0x326   : > { %s946_s19 = smov %s710_s20  ;;  %s947_s20 = smov %s788_s27 }
 0x327   : > { %s948_s21 = smov %s776_s24  ;;  %20 = sbr.rel (!%p18_p4) target bundleno = 5 (0x5), region = 85 }
 0x32e   :  { %477 = vsyncpa [#allocation3], 1 }
 0x32f   :  { %479 = vsyncpa [#allocation3 + $0x1], 1 }
 0x330   :  { %480 = vsyncpa [#allocation4], 1 }
 0x331   :  { %482 = vsyncpa [#allocation4 + $0x1], 1 }

</bundles_post_ra>
